<compile_context>
chip_gen: v6e
topology: v6e:2x2x1
jax: 0.10.0
libtpu: 0.0.40
codegen_flags: <defaults>
</compile_context>

<pallas_src>
import numpy as np
import jax
import jax.numpy as jnp
from jax.experimental import pallas as pl
from jax.experimental.pallas import tpu as pltpu


def _bispectrum_kernel(x_ref, cs_ref, wre_ref, wim_ref, out_ref):
    # x_ref:   (Bb*T, L)      -- Bb batch elements x T targets, one row each
    # cs_ref:  (L, 2L)        -- [COS | SIN],  COS[i,n] = cos(2*pi*i*n/L)
    # wre_ref: (2L, L)        -- [[COS],[SIN]]
    # wim_ref: (2L, L)        -- [[-SIN],[COS]]
    # out_ref: (Bb, 2, L, L)  -- averaged (Re, Im) bispectrum per batch element
    Bb = out_ref.shape[0]
    L = out_ref.shape[2]
    P = x_ref.shape[0]          # Bb * T
    T = P // Bb
    two_l = 2 * L

    x = x_ref[...]                                   # (P, L)
    x2 = jnp.concatenate([x, x], axis=-1)            # (P, 2L)

    # h2[p, i, :] = [cos(2*pi*i*n/L)*x[p,n] | sin(2*pi*i*n/L)*x[p,n]]
    h2 = cs_ref[...][None, :, :] * x2[:, None, :]    # (P, L, 2L)
    h2f = h2.reshape(P * L, two_l)                   # one big-M matmul operand

    # Circulant term C[i, j] = y[(j - i) mod L], real and imaginary parts,
    # each via a single fused-K matmul (no gather, no per-target loop).
    c_re = jnp.dot(h2f, wre_ref[...], preferred_element_type=jnp.float32)
    c_im = jnp.dot(h2f, wim_ref[...], preferred_element_type=jnp.float32)
    cr = c_re.reshape(P, L, L)
    ci = c_im.reshape(P, L, L)

    # DFT values read directly off the circulant result (x is real):
    #   C[0, j] = y[j]         C[i, 0] = conj(y[i])
    yre_r = cr[:, 0:1, :]                            # (P, 1, L)  Re y[j]
    yim_r = ci[:, 0:1, :]                            # (P, 1, L)  Im y[j]
    yre_c = cr[:, :, 0:1]                            # (P, L, 1)  Re y[i]
    yim_c = -ci[:, :, 0:1]                           # (P, L, 1)  Im y[i]

    # Outer product y[i] * conj(y[j])
    a_re = yre_c * yre_r + yim_c * yim_r             # (P, L, L)
    a_im = yim_c * yre_r - yre_c * yim_r             # (P, L, L)

    # Bx = outer * C (complex product)
    b_re = a_re * cr - a_im * ci
    b_im = a_re * ci + a_im * cr

    # Average over the T targets of each batch element.
    inv_t = jnp.float32(1.0 / T)
    re_m = jnp.sum(b_re.reshape(Bb, T, L, L), axis=1) * inv_t   # (Bb, L, L)
    im_m = jnp.sum(b_im.reshape(Bb, T, L, L), axis=1) * inv_t   # (Bb, L, L)

    out_ref[...] = jnp.concatenate([re_m[:, None], im_m[:, None]], axis=1)


def _pick_block_batch(B, T, L, budget_bytes=16 << 20, cap=8):
    """Largest divisor of B whose per-step f32 temporaries fit the budget."""
    per_elem = 12 * T * L * L * 4          # rough live f32 temporaries / element
    bb_max = max(1, min(cap, budget_bytes // max(per_elem, 1)))
    bb = 1
    for d in range(1, min(B, bb_max) + 1):
        if B % d == 0:
            bb = d
    return bb


def make_bispectrum_forward(targets_count, target_len, block_batch=None):
    L = int(target_len)
    T = int(targets_count)

    n = np.arange(L)
    ang = 2.0 * np.pi * np.outer(n, n) / L
    cos_m = np.cos(ang).astype(np.float32)                       # (L, L), symmetric
    sin_m = np.sin(ang).astype(np.float32)                       # (L, L), symmetric
    cs = jnp.asarray(np.concatenate([cos_m, sin_m], axis=1))     # (L, 2L)
    w_re = jnp.asarray(np.concatenate([cos_m, sin_m], axis=0))   # (2L, L)
    w_im = jnp.asarray(np.concatenate([-sin_m, cos_m], axis=0))  # (2L, L)

    def forward(target):
        # target: (B, T, L) float
        B, Tn, Ln = target.shape
        assert Tn == T and Ln == L
        x = target.astype(jnp.float32).reshape(B * T, L)

        bb = _pick_block_batch(B, T, L) if block_batch is None else int(block_batch)
        assert B % bb == 0, "block_batch must divide the batch size"
        grid = (B // bb,)

        source = pl.pallas_call(
            _bispectrum_kernel,
            out_shape=jax.ShapeDtypeStruct((B, 2, L, L), jnp.float32),
            grid_spec=pltpu.PrefetchScalarGridSpec(
                num_scalar_prefetch=0,
                grid=grid,
                in_specs=[
                    pl.BlockSpec((bb * T, L), lambda i: (i, 0)),
                    pl.BlockSpec((L, 2 * L), lambda i: (0, 0)),
                    pl.BlockSpec((2 * L, L), lambda i: (0, 0)),
                    pl.BlockSpec((2 * L, L), lambda i: (0, 0)),
                ],
                out_specs=pl.BlockSpec((bb, 2, L, L), lambda i: (i, 0, 0, 0)),
            ),
            compiler_params=pltpu.CompilerParams(
                dimension_semantics=("parallel",),
                vmem_limit_bytes=48 * 1024 * 1024,
            ),
        )(x, cs, w_re, w_im)

        # PyTorch forward returns (source, target); target values are unchanged.
        return source, target

    return forward


def _reference(target):
    """Pure-JAX reference mirroring the torch semantics (FFT + circulant)."""
    y = jnp.fft.fft(target.astype(jnp.float32), axis=-1)   # (B, T, L) complex
    L = target.shape[-1]
    i = jnp.arange(L)[:, None]
    j = jnp.arange(L)[None, :]
    C = y[..., (j - i) % L]                                 # (B, T, L, L)
    outer = y[..., :, None] * jnp.conj(y)[..., None, :]     # (B, T, L, L)
    Bx = jnp.mean(outer * C, axis=1)                        # (B, L, L)
    return jnp.stack([Bx.real, Bx.imag], axis=1).astype(jnp.float32)


if __name__ == "__main__":
    B, T, L = 2, 3, 16  # batch, targets_count, target_len
    key = jax.random.PRNGKey(0)
    target = jax.random.normal(key, (B, T, L), dtype=jnp.float32)

    fwd = make_bispectrum_forward(targets_count=T, target_len=L)
    source, target_out = jax.block_until_ready(fwd(target))

    assert source.shape == (B, 2, L, L)
    assert target_out.shape == (B, T, L)
    ref = _reference(target)
    np.testing.assert_allclose(np.asarray(source), np.asarray(ref),
                               rtol=2e-3, atol=1e-2)
    print("KERNEL_OK")
</pallas_src>

<mosaic_0001>
module attributes {stable_mosaic.version = 11 : i64} {
  func.func @_bispectrum_kernel(%arg0: i32, %arg1: memref<6x16xf32, #tpu.memory_space<vmem>>, %arg2: memref<16x32xf32, #tpu.memory_space<vmem>>, %arg3: memref<32x16xf32, #tpu.memory_space<vmem>>, %arg4: memref<32x16xf32, #tpu.memory_space<vmem>>, %arg5: memref<2x2x16x16xf32, #tpu.memory_space<vmem>>) attributes {dimension_semantics = [#tpu.dimension_semantics<parallel>], iteration_bounds = array<i64: 1>, scalar_prefetch = 0 : i64, scratch_operands = 0 : i64, tpu.core_type = #tpu.core_type<tc>, window_params = [{transform_indices = @transform_0, window_bounds = array<i64: 6, 16>}, {pipeline_mode = #tpu.pipeline_mode<synchronous>, transform_indices = @transform_1, window_bounds = array<i64: 16, 32>}, {pipeline_mode = #tpu.pipeline_mode<synchronous>, transform_indices = @transform_2, window_bounds = array<i64: 32, 16>}, {pipeline_mode = #tpu.pipeline_mode<synchronous>, transform_indices = @transform_3, window_bounds = array<i64: 32, 16>}, {transform_indices = @transform_4, window_bounds = array<i64: 2, 2, 16, 16>}]} {
    %c0 = arith.constant 0 : index
    %c0_0 = arith.constant 0 : index
    %0 = vector.load %arg1[%c0, %c0_0] : memref<6x16xf32, #tpu.memory_space<vmem>>, vector<6x16xf32>
    %1 = tpu.concatenate %0, %0 in 1 : vector<6x16xf32>, vector<6x16xf32> -> vector<6x32xf32>
    %c0_1 = arith.constant 0 : index
    %c0_2 = arith.constant 0 : index
    %2 = vector.load %arg2[%c0_1, %c0_2] : memref<16x32xf32, #tpu.memory_space<vmem>>, vector<16x32xf32>
    %3 = vector.shape_cast %2 : vector<16x32xf32> to vector<1x16x32xf32>
    %4 = vector.shape_cast %1 : vector<6x32xf32> to vector<6x1x32xf32>
    %5 = vector.broadcast %3 : vector<1x16x32xf32> to vector<6x16x32xf32>
    %6 = vector.broadcast %4 : vector<6x1x32xf32> to vector<6x16x32xf32>
    %7 = arith.mulf %5, %6 : vector<6x16x32xf32>
    %8 = vector.shape_cast %7 : vector<6x16x32xf32> to vector<96x32xf32>
    %c0_3 = arith.constant 0 : index
    %c0_4 = arith.constant 0 : index
    %9 = vector.load %arg3[%c0_3, %c0_4] : memref<32x16xf32, #tpu.memory_space<vmem>>, vector<32x16xf32>
    %cst = arith.constant dense<0.000000e+00> : vector<96x16xf32>
    %10 = tpu.matmul %8, %9, %cst {dimension_numbers = #tpu.dot_dimension_numbers<[1], [0], [0], [1], [0, 0, 1, 1], [], []>} : vector<96x32xf32>, vector<32x16xf32>, vector<96x16xf32> -> vector<96x16xf32>
    %c0_5 = arith.constant 0 : index
    %c0_6 = arith.constant 0 : index
    %11 = vector.load %arg4[%c0_5, %c0_6] : memref<32x16xf32, #tpu.memory_space<vmem>>, vector<32x16xf32>
    %cst_7 = arith.constant dense<0.000000e+00> : vector<96x16xf32>
    %12 = tpu.matmul %8, %11, %cst_7 {dimension_numbers = #tpu.dot_dimension_numbers<[1], [0], [0], [1], [0, 0, 1, 1], [], []>} : vector<96x32xf32>, vector<32x16xf32>, vector<96x16xf32> -> vector<96x16xf32>
    %13 = vector.shape_cast %10 : vector<96x16xf32> to vector<6x16x16xf32>
    %14 = vector.shape_cast %12 : vector<96x16xf32> to vector<6x16x16xf32>
    %15 = vector.extract_strided_slice %13 {offsets = [0, 0, 0], sizes = [6, 1, 16], strides = [1, 1, 1]} : vector<6x16x16xf32> to vector<6x1x16xf32>
    %16 = vector.extract_strided_slice %14 {offsets = [0, 0, 0], sizes = [6, 1, 16], strides = [1, 1, 1]} : vector<6x16x16xf32> to vector<6x1x16xf32>
    %17 = vector.extract_strided_slice %13 {offsets = [0, 0, 0], sizes = [6, 16, 1], strides = [1, 1, 1]} : vector<6x16x16xf32> to vector<6x16x1xf32>
    %18 = vector.extract_strided_slice %14 {offsets = [0, 0, 0], sizes = [6, 16, 1], strides = [1, 1, 1]} : vector<6x16x16xf32> to vector<6x16x1xf32>
    %cst_8 = arith.constant 0.000000e+00 : f32
    %19 = vector.broadcast %cst_8 : f32 to vector<6x16x1xf32>
    %20 = arith.subf %19, %18 : vector<6x16x1xf32>
    %21 = vector.broadcast %17 : vector<6x16x1xf32> to vector<6x16x16xf32>
    %22 = vector.broadcast %15 : vector<6x1x16xf32> to vector<6x16x16xf32>
    %23 = arith.mulf %21, %22 : vector<6x16x16xf32>
    %24 = vector.broadcast %20 : vector<6x16x1xf32> to vector<6x16x16xf32>
    %25 = vector.broadcast %16 : vector<6x1x16xf32> to vector<6x16x16xf32>
    %26 = arith.mulf %24, %25 : vector<6x16x16xf32>
    %27 = arith.addf %23, %26 : vector<6x16x16xf32>
    %28 = vector.broadcast %20 : vector<6x16x1xf32> to vector<6x16x16xf32>
    %29 = vector.broadcast %15 : vector<6x1x16xf32> to vector<6x16x16xf32>
    %30 = arith.mulf %28, %29 : vector<6x16x16xf32>
    %31 = vector.broadcast %17 : vector<6x16x1xf32> to vector<6x16x16xf32>
    %32 = vector.broadcast %16 : vector<6x1x16xf32> to vector<6x16x16xf32>
    %33 = arith.mulf %31, %32 : vector<6x16x16xf32>
    %34 = arith.subf %30, %33 : vector<6x16x16xf32>
    %35 = arith.mulf %27, %13 : vector<6x16x16xf32>
    %36 = arith.mulf %34, %14 : vector<6x16x16xf32>
    %37 = arith.subf %35, %36 : vector<6x16x16xf32>
    %38 = arith.mulf %27, %14 : vector<6x16x16xf32>
    %39 = arith.mulf %34, %13 : vector<6x16x16xf32>
    %40 = arith.addf %38, %39 : vector<6x16x16xf32>
    %41 = vector.shape_cast %37 : vector<6x16x16xf32> to vector<2x3x16x16xf32>
    %cst_9 = arith.constant dense<0.000000e+00> : vector<2x16x16xf32>
    %42 = vector.multi_reduction <add>, %41, %cst_9 [1] : vector<2x3x16x16xf32> to vector<2x16x16xf32>
    %cst_10 = arith.constant 0.333333343 : f32
    %43 = vector.broadcast %cst_10 : f32 to vector<2x16x16xf32>
    %44 = arith.mulf %42, %43 : vector<2x16x16xf32>
    %45 = vector.shape_cast %40 : vector<6x16x16xf32> to vector<2x3x16x16xf32>
    %cst_11 = arith.constant dense<0.000000e+00> : vector<2x16x16xf32>
    %46 = vector.multi_reduction <add>, %45, %cst_11 [1] : vector<2x3x16x16xf32> to vector<2x16x16xf32>
    %cst_12 = arith.constant 0.333333343 : f32
    %47 = vector.broadcast %cst_12 : f32 to vector<2x16x16xf32>
    %48 = arith.mulf %46, %47 : vector<2x16x16xf32>
    %49 = vector.shape_cast %44 : vector<2x16x16xf32> to vector<2x1x16x16xf32>
    %50 = vector.shape_cast %48 : vector<2x16x16xf32> to vector<2x1x16x16xf32>
    %51 = tpu.concatenate %49, %50 in 1 : vector<2x1x16x16xf32>, vector<2x1x16x16xf32> -> vector<2x2x16x16xf32>
    %c0_13 = arith.constant 0 : index
    %c0_14 = arith.constant 0 : index
    %c0_15 = arith.constant 0 : index
    %c0_16 = arith.constant 0 : index
    %52 = vector.load %arg5[%c0_13, %c0_14, %c0_15, %c0_16] : memref<2x2x16x16xf32, #tpu.memory_space<vmem>>, vector<2x2x16x16xf32>
    tpu.vector_store %arg5[%c0_13, %c0_14, %c0_15, %c0_16], %51 {strides = array<i32>} : memref<2x2x16x16xf32, #tpu.memory_space<vmem>>, vector<2x2x16x16xf32>,
    return
  }
  func.func @transform_0(%arg0: i32) -> (i32, i32) {
    %c0_i32 = arith.constant 0 : i32
    %c0_i32_0 = arith.constant 0 : i32
    return %arg0, %c0_i32 : i32, i32
  }
  func.func @transform_1(%arg0: i32) -> (i32, i32) {
    %c0_i32 = arith.constant 0 : i32
    %c0_i32_0 = arith.constant 0 : i32
    %c0_i32_1 = arith.constant 0 : i32
    return %c0_i32, %c0_i32_0 : i32, i32
  }
  func.func @transform_2(%arg0: i32) -> (i32, i32) {
    %c0_i32 = arith.constant 0 : i32
    %c0_i32_0 = arith.constant 0 : i32
    %c0_i32_1 = arith.constant 0 : i32
    return %c0_i32, %c0_i32_0 : i32, i32
  }
  func.func @transform_3(%arg0: i32) -> (i32, i32) {
    %c0_i32 = arith.constant 0 : i32
    %c0_i32_0 = arith.constant 0 : i32
    %c0_i32_1 = arith.constant 0 : i32
    return %c0_i32, %c0_i32_0 : i32, i32
  }
  func.func @transform_4(%arg0: i32) -> (i32, i32, i32, i32) {
    %c0_i32 = arith.constant 0 : i32
    %c0_i32_0 = arith.constant 0 : i32
    %c0_i32_1 = arith.constant 0 : i32
    %c0_i32_2 = arith.constant 0 : i32
    return %arg0, %c0_i32, %c0_i32_0, %c0_i32_1 : i32, i32, i32, i32
  }
}

</mosaic_0001>

<bundles_post_ra>
// kernel: tpu_custom_call.1
= control target key start
LH: loop header
LB: loop body
LE: loop exit
PB: predicated region body
PF: predicated region fallthrough
CT: control target
= control target key end

     0   :  { %s946_s17 = smov 16   ;;  %s1259_s0 = inlined_call_operand.vmem [shape: f32[6,16], index: 0, kind: input, shape index: {}]   ;;  %s1260_s1 = inlined_call_operand.vmem [shape: f32[16,32], index: 1, kind: input, shape index: {}]   ;;  %s1261_s2 = inlined_call_operand.vmem [shape: f32[32,16], index: 2, kind: input, shape index: {}]   ;;  %s1262_s3 = inlined_call_operand.vmem [shape: f32[32,16], index: 3, kind: input, shape index: {}]   ;;  %s1263_s4 = inlined_call_operand.hbm [shape: f32[2,2,16,16], index: 4, kind: output, shape index: {}]  }
   0x1   :  { %v18_v0 = vld [vmem:[%s1259_s0] sm:$0x3f]  ;;  %v120_v1 = vld [vmem:[%s1261_s2 + $0x18] sm:$0xff]  ;;  %v119_v3 = vld [vmem:[%s1261_s2 + $0x10] sm:$0xff] }
   0x2   :  { %20 = vrot.lane.b32.xlu0 %v18_v0, %s946_s17  ;;  %v286_v2 = vld [vmem:[%s1262_s3 + $0x18] sm:$0xff]  ;;  %864 = vmatprep.subr.mxu0 %v120_v1  ;;  %v285_v4 = vld [vmem:[%s1262_s3 + $0x10] sm:$0xff]  ;;  %v118_v5 = vld [vmem:[%s1261_s2 + $0x8] sm:$0xff] }
   0x3   :  { %890 = vmatprep.subr.mxu1 %v286_v2  ;;  %865 = vmatpush3.msra.mxu0 %v120_v1  ;;  %v284_v6 = vld [vmem:[%s1262_s3 + $0x8] sm:$0xff] }
   0x4   :  { %891 = vmatpush3.msra.mxu1 %v286_v2  ;;  %866 = vmatprep.subr.mxu0 %v119_v3 }
   0x5   :  { %892 = vmatprep.subr.mxu1 %v285_v4 }
   0x6   :  { %9 = vsyncpa [#allocation3], 0  ;;  %867 = vmatpush3.msra.mxu0 %v119_v3  ;;  %893 = vmatpush3.msra.mxu1 %v285_v4  ;;  %v117_v7 = vld [vmem:[%s1261_s2] sm:$0xff]  ;;  %v947_v9 = vmov 0   ;;  %v948_v10 = vmov 1966171168   ;;  %v32_v12 = vlaneseq }
   0x7   :  { %v283_v8 = vld [vmem:[%s1262_s3] sm:$0xff]  ;;  %868 = vmatprep.subr.mxu0 %v118_v5  ;;  %894 = vmatprep.subr.mxu1 %v284_v6  ;;  %v30_v11 = vunpack.c.l.s4 %v948_v10  ;;  %vm23_vm0 = vcmask 130048   ;;  %v26_v24 = vld [vmem:[%s1260_s1 + $0x8] sm:$0xff]  ;;  %vm121_vm1 = vcmask 261120  }
   0x8   :  { %869 = vmatpush3.msra.mxu0 %v118_v5  ;;  %895 = vmatpush3.msra.mxu1 %v284_v6  ;;  %v33_v14 = vshrl.u32 %v32_v12, 7  ;;  %v25_v23 = vld [vmem:[%s1260_s1] sm:$0xff]  ;;  %s949_s1 = smov [#allocation2]  }
   0x9   :  { %870 = vmatprep.subr.mxu0 %v117_v7  ;;  %896 = vmatprep.subr.mxu1 %v283_v8  ;;  %v31_v13 = vunpack.c.0.s8 %v30_v11  ;;  %s797_s9 = sshll.u32 %s949_s1, 4  ;;  %s798_s9 = int_to_ptr.vmem [resolvable:$true] %s797_s9 }
   0xa   :  { %871 = vmatpush3.msra.mxu0 %v117_v7  ;;  %897 = vmatpush3.msra.mxu1 %v283_v8  ;;  %v1005_v19 = vsub.s32 0, %v33_v14  ;;  %s924_s10 = scalar_lea.vmem %s798_s9, 1024  ;;  %p929_p1 = scmp.lt.s32.totalorder %s798_s9, %s798_s9 }
   0xb   :  { %922 = vset.pattern.permute.xlu1 %v947_v9  ;;  %923 = vset.pattern.permute.xlu0 %v947_v9  ;;  %v34_v15 = vsub.s32 %v31_v13, %v33_v14  ;;  %p925_p0 = scmp.ne.s32.totalorder %s798_s9, %s924_s10  ;;  %p930_p2 = scmp.lt.s32.totalorder %s924_s10, %s924_s10 }
   0xd   :  { %p931_p3 = por %p930_p2, %p929_p1 }
   0xf   :  { %p932_p4 = pnand %p931_p3, %p925_p0 }
  0x74   :  { %v21_v16 = vpop.permute.xlu0 %20 }
  0x75   :  { %v24_v17 = vsel %vm23_vm0, %v18_v0, %v21_v16 }
  0x76   :  { %v35_v18 = vrot.slane %v24_v17, %v34_v15  ;;  %v28_v25 = vcombine.high %v24_v17, %v24_v17 }
  0x78   :  { %v43_v20 = vcombine.high %v35_v18, %v35_v18  ;;  %v51_v21 = vrot.slane %v35_v18, %v34_v15  ;;  %v42_v32 = vrot.slane %v28_v25, %v34_v15 }
  0x7a   :  { %v65_v22 = vrot.slane %v43_v20, %v34_v15  ;;  %v73_v26 = vcombine.high %v51_v21, %v51_v21  ;;  %v78_v27 = vrot.slane %v51_v21, %v1005_v19  ;;  %v44_v36 = vcombine.high %v42_v32, %v42_v32 }
  0x7b   :  { %v58_v37 = vrot.slane %v42_v32, %v34_v15 }
  0x7c   :  { %v82_v28 = vrot.slane %v65_v22, %v1005_v19  ;;  %v105_v29 = vmul.f32 %v78_v27, %v25_v23  ;;  %v106_v30 = vmul.f32 %v78_v27, %v26_v24  ;;  %v74_v33 = vcombine.high %v65_v22, %v65_v22 }
  0x7d   :  { %v86_v34 = vrot.slane %v73_v26, %v1005_v19  ;;  %v72_v41 = vrot.slane %v44_v36, %v34_v15  ;;  %v94_v42 = vrot.slane %v58_v37, %v1005_v19 }
  0x7e   :  { %v107_v31 = vmul.f32 %v82_v28, %v25_v23  ;;  %872 = vmatprep.mubr.msk.f32.mxu0 %vm121_vm1, %v105_v29  ;;  %898 = vmatprep.mubr.msk.f32.mxu1 %vm121_vm1, %v105_v29  ;;  %v108_v35 = vmul.f32 %v82_v28, %v26_v24  ;;  %v90_v39 = vrot.slane %v74_v33, %v1005_v19 }
  0x7f   :  { %873 = vmatmul.mubr.msk.f32.vlgmr.msra.gmra.mxu0 %vm121_vm1, %v106_v30  ;;  %899 = vmatmul.mubr.msk.f32.vlgmr.msra.gmra.mxu1 %vm121_vm1, %v106_v30  ;;  %v109_v38 = vmul.f32 %v86_v34, %v25_v23  ;;  %v110_v40 = vmul.f32 %v86_v34, %v26_v24  ;;  %v113_v45 = vmul.f32 %v94_v42, %v25_v23 }
  0x80   :  { %875 = vmatprep.mubr.msk.f32.mxu0 %vm121_vm1, %v107_v31  ;;  %901 = vmatprep.mubr.msk.f32.mxu1 %vm121_vm1, %v107_v31  ;;  %v111_v43 = vmul.f32 %v90_v39, %v25_v23  ;;  %v112_v44 = vmul.f32 %v90_v39, %v26_v24  ;;  %v98_v46 = vrot.slane %v72_v41, %v1005_v19 }
  0x81   :  { %v114_v47 = vmul.f32 %v94_v42, %v26_v24 }
  0x82   :  { %v115_v48 = vmul.f32 %v98_v46, %v25_v23  ;;  %v116_v49 = vmul.f32 %v98_v46, %v26_v24 }
  0x83   :  { %876 = vmatmul.mubr.msk.f32.gmra.mxu0 %vm121_vm1, %v108_v35  ;;  %902 = vmatmul.mubr.msk.f32.gmra.mxu1 %vm121_vm1, %v108_v35 }
  0x84   :  { %878 = vmatprep.mubr.msk.f32.mxu0 %vm121_vm1, %v109_v38  ;;  %904 = vmatprep.mubr.msk.f32.mxu1 %vm121_vm1, %v109_v38 }
  0x87   :  { %879 = vmatmul.mubr.msk.f32.gmra.mxu0 %vm121_vm1, %v110_v40  ;;  %905 = vmatmul.mubr.msk.f32.gmra.mxu1 %vm121_vm1, %v110_v40 }
  0x88   :  { %881 = vmatprep.mubr.msk.f32.mxu0 %vm121_vm1, %v111_v43  ;;  %907 = vmatprep.mubr.msk.f32.mxu1 %vm121_vm1, %v111_v43 }
  0x8b   :  { %882 = vmatmul.mubr.msk.f32.gmra.mxu0 %vm121_vm1, %v112_v44  ;;  %908 = vmatmul.mubr.msk.f32.gmra.mxu1 %vm121_vm1, %v112_v44 }
  0x8c   :  { %884 = vmatprep.mubr.msk.f32.mxu0 %vm121_vm1, %v113_v45  ;;  %910 = vmatprep.mubr.msk.f32.mxu1 %vm121_vm1, %v113_v45 }
  0x8f   :  { %885 = vmatmul.mubr.msk.f32.gmra.mxu0 %vm121_vm1, %v114_v47  ;;  %911 = vmatmul.mubr.msk.f32.gmra.mxu1 %vm121_vm1, %v114_v47 }
  0x90   :  { %887 = vmatprep.mubr.msk.f32.mxu0 %vm121_vm1, %v115_v48  ;;  %913 = vmatprep.mubr.msk.f32.mxu1 %vm121_vm1, %v115_v48 }
  0x93   :  { %888 = vmatmul.mubr.msk.f32.gmra.mxu0 %vm121_vm1, %v116_v49  ;;  %914 = vmatmul.mubr.msk.f32.gmra.mxu1 %vm121_vm1, %v116_v49 }
 0x13f   :  { %v1043_v50 = vpop.f32.mrf.mxu0  ;;  %v1045_v51 = vpop.f32.mrf.mxu1 }
 0x140   :  { %431 = vperm.xlu1 %922, %v1043_v50   ;;  %v413_v56 = vsub.f32 0.0, %v1045_v51 }
 0x141   :  { %v1048_v52 = vpop.f32.mrf.mxu0  ;;  %v1050_v53 = vpop.f32.mrf.mxu1 }
 0x142   :  { %426 = vperm.xlu0 %923, %v1048_v52   ;;  %v412_v59 = vsub.f32 0.0, %v1050_v53  ;;  %v487_v26 = vrot.slane %v1048_v52, %v1005_v19  ;;  %v583_v27 = vrot.slane %v1050_v53, %v1005_v19 }
 0x143   :  { %v1053_v54 = vpop.f32.mrf.mxu0  ;;  %v1055_v55 = vpop.f32.mrf.mxu1 }
 0x144   :  { %441 = vperm.xlu1 %922, %v1053_v54   ;;  %v415_v60 = vsub.f32 0.0, %v1055_v55 }
 0x145   :  { %v1059_v57 = vpop.f32.mrf.mxu0  ;;  %v1061_v58 = vpop.f32.mrf.mxu1 }
 0x146   :  { %527 = vperm.xlu0 %923, %v413_v56   ;;  %v414_v1 = vsub.f32 0.0, %v1061_v58  ;;  %v491_v38 = vrot.slane %v1059_v57, %v1005_v19  ;;  %v587_v39 = vrot.slane %v1061_v58, %v1005_v19 }
 0x147   :  { %v1065_v61 = vpop.f32.mrf.mxu0  ;;  %v1067_v62 = vpop.f32.mrf.mxu1 }
 0x148   :  { %522 = vperm.xlu1 %922, %v412_v59   ;;  %v417_v7 = vsub.f32 0.0, %v1067_v62 }
 0x149   :  { %v1070_v63 = vpop.f32.mrf.mxu0  ;;  %v1072_v0 = vpop.f32.mrf.mxu1 }
 0x14a   :  { %537 = vperm.xlu0 %923, %v415_v60   ;;  %v416_v4 = vsub.f32 0.0, %v1072_v0  ;;  %v495_v60 = vrot.slane %v1070_v63, %v1005_v19 }
 0x14b   :  { %v1076_v2 = vpop.f32.mrf.mxu0  ;;  %v1078_v3 = vpop.f32.mrf.mxu1 }
 0x14c   :  { %436 = vperm.xlu1 %922, %v1059_v57   ;;  %v419_v8 = vsub.f32 0.0, %v1078_v3 }
 0x14d   :  { %v1083_v5 = vpop.f32.mrf.mxu0  ;;  %v1085_v6 = vpop.f32.mrf.mxu1 }
 0x14e   :  { %446 = vperm.xlu0 %923, %v1070_v63   ;;  %v418_v13 = vsub.f32 0.0, %v1085_v6 }
 0x14f   :  { %v1089_v9 = vpop.f32.mrf.mxu0  ;;  %v1091_v10 = vpop.f32.mrf.mxu1 }
 0x150   :  { %532 = vperm.xlu1 %922, %v414_v1   ;;  %v421_v14 = vsub.f32 0.0, %v1091_v10  ;;  %v591_v1 = vrot.slane %v1072_v0, %v1005_v19 }
 0x151   :  { %v1094_v11 = vpop.f32.mrf.mxu0  ;;  %v1096_v12 = vpop.f32.mrf.mxu1 }
 0x152   :  { %461 = vperm.xlu0 %923, %v1076_v2   ;;  %v420_v20 = vsub.f32 0.0, %v1096_v12 }
 0x153   :  { %v1101_v15 = vpop.f32.mrf.mxu0  ;;  %v1103_v16 = vpop.f32.mrf.mxu1 }
 0x154   :  { %451 = vperm.xlu1 %922, %v1065_v61   ;;  %v423_v22 = vsub.f32 0.0, %v1103_v16 }
 0x155   :  { %v1106_v17 = vpop.f32.mrf.mxu0  ;;  %v1108_v18 = vpop.f32.mrf.mxu1 }
 0x156   :  { %542 = vperm.xlu0 %923, %v416_v4   ;;  %v422_v21 = vsub.f32 0.0, %v1108_v18 }
 0x158   :  { %547 = vperm.xlu1 %922, %v417_v7  }
 0x15a   :  { %557 = vperm.xlu0 %923, %v419_v8  }
 0x15c   :  { %456 = vperm.xlu1 %922, %v1083_v5  }
 0x15e   :  { %471 = vperm.xlu0 %923, %v1089_v9  }
 0x160   :  { %552 = vperm.xlu1 %922, %v418_v13  }
 0x162   :  { %567 = vperm.xlu0 %923, %v421_v14  }
 0x164   :  { %466 = vperm.xlu1 %922, %v1094_v11  }
 0x166   :  { %476 = vperm.xlu0 %923, %v1106_v17  }
 0x168   :  { %562 = vperm.xlu1 %922, %v420_v20   ;;  %v1133_v20 = vrot.slane %v1083_v5, %v1005_v19 }
 0x16a   :  { %572 = vperm.xlu0 %923, %v422_v21   ;;  %v1137_v21 = vrot.slane %v1085_v6, %v1005_v19 }
 0x16c   :  { %481 = vperm.xlu1 %922, %v1101_v15  }
 0x170   :  { %577 = vperm.xlu1 %922, %v423_v22   ;;  %v1141_v22 = vrot.slane %v1094_v11, %v1005_v19 }
 0x1bb   :  { %v432_v23 = vpop.permute.xlu1 %431 }
 0x1bc   :  { %v509_v29 = vmul.f32 %v487_v26, %v432_v23  ;;  %v641_v30 = vmul.f32 %v583_v27, %v432_v23 }
 0x1bd   :  { %v427_v24 = vpop.permute.xlu0 %426 }
 0x1be   :  { %v508_v41 = vmul.f32 %v487_v26, %v427_v24  ;;  %v640_v42 = vmul.f32 %v583_v27, %v427_v24 }
 0x1bf   :  { %v442_v25 = vpop.permute.xlu1 %441 }
 0x1c0   :  { %v511_v48 = vmul.f32 %v491_v38, %v442_v25  ;;  %v643_v49 = vmul.f32 %v587_v39, %v442_v25 }
 0x1c1   :  { %v528_v28 = vpop.permute.xlu0 %527 }
 0x1c2   :  { %v605_v31 = vmul.f32 %v583_v27, %v528_v28  ;;  %v629_v32 = vmul.f32 %v528_v28, %v487_v26 }
 0x1c3   :  { %v523_v33 = vpop.permute.xlu1 %522 }
 0x1c4   :  { %v617_v34 = vadd.f32 %v605_v31, %v509_v29  ;;  %v653_v35 = vsub.f32 %v629_v32, %v641_v30  ;;  %v604_v36 = vmul.f32 %v583_v27, %v523_v33  ;;  %v628_v37 = vmul.f32 %v523_v33, %v487_v26 }
 0x1c5   :  { %v538_v40 = vpop.permute.xlu0 %537  ;;  %v1151_v32 = vrot.slane %v1096_v12, %v1005_v19 }
 0x1c6   :  { %v665_v43 = vmul.f32 %v1043_v50, %v617_v34  ;;  %v677_v44 = vmul.f32 %v1045_v51, %v653_v35  ;;  %v607_v45 = vmul.f32 %v587_v39, %v538_v40  ;;  %v631_v46 = vmul.f32 %v538_v40, %v491_v38 }
 0x1c7   :  { %v437_v47 = vpop.permute.xlu1 %436  ;;  %v616_v56 = vadd.f32 %v604_v36, %v508_v41  ;;  %v652_v59 = vsub.f32 %v628_v37, %v640_v42  ;;  %v701_v7 = vmul.f32 %v1045_v51, %v617_v34  ;;  %v713_v8 = vmul.f32 %v1043_v50, %v653_v35 }
 0x1c8   :  { %v619_v13 = vadd.f32 %v607_v45, %v511_v48  ;;  %v655_v14 = vsub.f32 %v631_v46, %v643_v49  ;;  %v689_v23 = vsub.f32 %v665_v43, %v677_v44  ;;  %v510_v27 = vmul.f32 %v491_v38, %v437_v47 }
 0x1c9   :  { %v447_v4 = vpop.permute.xlu0 %446  ;;  %v664_v51 = vmul.f32 %v616_v56, %v1048_v52  ;;  %v676_v50 = vmul.f32 %v652_v59, %v1050_v53  ;;  %v700_v25 = vmul.f32 %v616_v56, %v1050_v53  ;;  %v712_v26 = vmul.f32 %v652_v59, %v1048_v52 }
 0x1ca   :  { %v642_v28 = vmul.f32 %v587_v39, %v437_v47  ;;  %v725_v33 = vadd.f32 %v713_v8, %v701_v7  ;;  %v667_v34 = vmul.f32 %v1053_v54, %v619_v13  ;;  %v679_v35 = vmul.f32 %v1055_v55, %v655_v14 }
 0x1cb   :  { %v533_v24 = vpop.permute.xlu1 %532  ;;  %v703_v36 = vmul.f32 %v1055_v55, %v619_v13  ;;  %v715_v53 = vmul.f32 %v1053_v54, %v655_v14  ;;  %v688_v41 = vsub.f32 %v664_v51, %v676_v50  ;;  %v724_v42 = vadd.f32 %v712_v26, %v700_v25 }
 0x1cc   :  { %v606_v29 = vmul.f32 %v587_v39, %v533_v24  ;;  %v630_v30 = vmul.f32 %v533_v24, %v491_v38  ;;  %v1159_v38 = vrot.slane %v1106_v17, %v1005_v19  ;;  %v741_v39 = vsel %vm23_vm0, %v689_v23, 0.0 }
 0x1cd   :  { %v1147_v31 = vpop.permute.xlu0 %461  ;;  %v512_v43 = vmul.f32 %v495_v60, %v447_v4  ;;  %v644_v44 = vmul.f32 %v591_v1, %v447_v4  ;;  %v765_v56 = vsel %vm23_vm0, %v725_v33, 0.0  ;;  %v691_v59 = vsub.f32 %v667_v34, %v679_v35 }
 0x1ce   :  { %v618_v52 = vadd.f32 %v606_v29, %v510_v27  ;;  %v654_v37 = vsub.f32 %v630_v30, %v642_v28  ;;  %v727_v7 = vadd.f32 %v715_v53, %v703_v36  ;;  %v736_v51 = vsel %vm23_vm0, %v688_v41, 0.0 }
 0x1cf   :  { %v452_v40 = vpop.permute.xlu1 %451  ;;  %v760_v50 = vsel %vm23_vm0, %v724_v42, 0.0  ;;  %v742_v53 = vsel %vm23_vm0, %v691_v59, 0.0 }
 0x1d0   :  { %v666_v45 = vmul.f32 %v618_v52, %v1059_v57  ;;  %v678_v46 = vmul.f32 %v654_v37, %v1061_v58  ;;  %v702_v54 = vmul.f32 %v618_v52, %v1061_v58  ;;  %v714_v47 = vmul.f32 %v654_v37, %v1059_v57 }
 0x1d1   :  { %v543_v55 = vpop.permute.xlu0 %542  ;;  %v513_v25 = vmul.f32 %v495_v60, %v452_v40  ;;  %v645_v27 = vmul.f32 %v591_v1, %v452_v40 }
 0x1d2   :  { %v608_v48 = vmul.f32 %v591_v1, %v543_v55  ;;  %v632_v49 = vmul.f32 %v543_v55, %v495_v60  ;;  %v690_v8 = vsub.f32 %v666_v45, %v678_v46  ;;  %v726_v14 = vadd.f32 %v714_v47, %v702_v54 }
 0x1d3   :  { %v548_v13 = vpop.permute.xlu1 %547  ;;  %v515_v46 = vmul.f32 %v1133_v20, %v1147_v31 }
 0x1d4   :  { %v620_v23 = vadd.f32 %v608_v48, %v512_v43  ;;  %v656_v4 = vsub.f32 %v632_v49, %v644_v44  ;;  %v609_v24 = vmul.f32 %v591_v1, %v548_v13  ;;  %v633_v58 = vmul.f32 %v548_v13, %v495_v60 }
 0x1d5   :  { %v558_v26 = vpop.permute.xlu0 %557  ;;  %v737_v57 = vsel %vm23_vm0, %v690_v8, 0.0  ;;  %v761_v30 = vsel %vm23_vm0, %v726_v14, 0.0  ;;  %v766_v60 = vsel %vm23_vm0, %v727_v7, 0.0  ;;  %v647_v49 = vmul.f32 %v1137_v21, %v1147_v31 }
 0x1d6   :  { %v668_v28 = vmul.f32 %v620_v23, %v1070_v63  ;;  %v680_v29 = vmul.f32 %v656_v4, %v1072_v0  ;;  %v704_v33 = vmul.f32 %v620_v23, %v1072_v0  ;;  %v716_v34 = vmul.f32 %v656_v4, %v1070_v63 }
 0x1d7   :  { %v621_v35 = vadd.f32 %v609_v24, %v513_v25  ;;  %v457_v36 = vpop.permute.xlu1 %456  ;;  %v657_v37 = vsub.f32 %v633_v58, %v645_v27  ;;  %v738_v41 = vadd.f32 %v737_v57, %v736_v51  ;;  %v762_v44 = vadd.f32 %v761_v30, %v760_v50 }
 0x1d8   :  { %v692_v52 = vsub.f32 %v668_v28, %v680_v29  ;;  %v728_v1 = vadd.f32 %v716_v34, %v704_v33  ;;  %v611_v47 = vmul.f32 %v1137_v21, %v558_v26  ;;  %v743_v13 = vadd.f32 %v742_v53, %v741_v39 }
 0x1d9   :  { %v669_v40 = vmul.f32 %v1065_v61, %v621_v35  ;;  %v705_v42 = vmul.f32 %v1067_v62, %v621_v35  ;;  %v472_v43 = vpop.permute.xlu0 %471  ;;  %v681_v63 = vmul.f32 %v1067_v62, %v657_v37  ;;  %v717_v45 = vmul.f32 %v1065_v61, %v657_v37 }
 0x1da   :  { %v739_v0 = vsel %vm23_vm0, %v692_v52, 0.0  ;;  %v763_v54 = vsel %vm23_vm0, %v728_v1, 0.0  ;;  %v767_v14 = vadd.f32 %v766_v60, %v765_v56  ;;  %v635_v61 = vmul.f32 %v558_v26, %v1133_v20 }
 0x1db   :  { %v740_v55 = vadd.f32 %v739_v0, %v738_v41  ;;  %v553_v48 = vpop.permute.xlu1 %552  ;;  %v764_v59 = vadd.f32 %v763_v54, %v762_v44  ;;  %v693_v7 = vsub.f32 %v669_v40, %v681_v63  ;;  %v729_v8 = vadd.f32 %v717_v45, %v705_v42 }
 0x1dc   :  { %v514_v50 = vmul.f32 %v1133_v20, %v457_v36  ;;  %v623_v58 = vadd.f32 %v611_v47, %v515_v46  ;;  %v646_v57 = vmul.f32 %v1137_v21, %v457_v36  ;;  %v517_v56 = vmul.f32 %v1141_v22, %v472_v43 }
 0x1dd   :  { %v756_v62 = vmul.f32 0.33333334, %v740_v55  ;;  %v568_v23 = vpop.permute.xlu0 %567  ;;  %v780_v4 = vmul.f32 0.33333334, %v764_v59  ;;  %v744_v24 = vsel %vm23_vm0, %v693_v7, 0.0  ;;  %v768_v51 = vsel %vm23_vm0, %v729_v8, 0.0 }
 0x1de   :  { %v745_v25 = vadd.f32 %v744_v24, %v743_v13  ;;  %v769_v31 = vadd.f32 %v768_v51, %v767_v14  ;;  %v610_v26 = vmul.f32 %v1137_v21, %v553_v48  ;;  %v634_v27 = vmul.f32 %v553_v48, %v1133_v20 }
 0x1df   :  { %784 = vst.msk [vmem:[#allocation2] sm:$0xff] %vm23_vm0, %v756_v62  ;;  %v467_v39 = vpop.permute.xlu1 %466  ;;  %786 = vst.msk [vmem:[#allocation2 + $0x10] sm:$0xff] %vm23_vm0, %v780_v4  ;;  %v613_v28 = vmul.f32 %v1151_v32, %v568_v23  ;;  %v603_v29 = vrot.slane %v1108_v18, %v1005_v19  ;;  %v659_v34 = vsub.f32 %v635_v61, %v647_v49 }
 0x1e0   :  { %v757_v30 = vmul.f32 0.33333334, %v745_v25  ;;  %v781_v33 = vmul.f32 0.33333334, %v769_v31  ;;  %v622_v53 = vadd.f32 %v610_v26, %v514_v50  ;;  %v658_v36 = vsub.f32 %v634_v27, %v646_v57 }
 0x1e1   :  { %v477_v35 = vpop.permute.xlu0 %476  ;;  %v625_v60 = vadd.f32 %v613_v28, %v517_v56  ;;  %v637_v52 = vmul.f32 %v568_v23, %v1141_v22  ;;  %v1205_v20 = vmul.f32 %v1076_v2, %v623_v58  ;;  %v649_v21 = vmul.f32 %v1151_v32, %v472_v43 }
 0x1e2   :  { %785 = vst.msk [vmem:[#allocation2 + $0x8] sm:$0xff] %vm23_vm0, %v757_v30  ;;  %787 = vst.msk [vmem:[#allocation2 + $0x18] sm:$0xff] %vm23_vm0, %v781_v33  ;;  %v516_v19 = vmul.f32 %v1141_v22, %v467_v39  ;;  %v648_v37 = vmul.f32 %v1151_v32, %v467_v39  ;;  %v670_v1 = vmul.f32 %v622_v53, %v1083_v5 }
 0x1e3   :  { %v563_v41 = vpop.permute.xlu1 %562  ;;  %v682_v40 = vmul.f32 %v658_v36, %v1085_v6  ;;  %v706_v42 = vmul.f32 %v622_v53, %v1085_v6  ;;  %v718_v44 = vmul.f32 %v658_v36, %v1083_v5  ;;  %v661_v0 = vsub.f32 %v637_v52, %v649_v21 }
 0x1e4   :  { %v518_v63 = vmul.f32 %v1159_v38, %v477_v35  ;;  %v650_v45 = vmul.f32 %v603_v29, %v477_v35  ;;  %v612_v46 = vmul.f32 %v1151_v32, %v563_v41  ;;  %v673_v55 = vmul.f32 %v1089_v9, %v625_v60 }
 0x1e5   :  { %v573_v43 = vpop.permute.xlu0 %572  ;;  %v709_v54 = vmul.f32 %v1091_v10, %v625_v60  ;;  %v636_v47 = vmul.f32 %v563_v41, %v1141_v22  ;;  %v694_v49 = vsub.f32 %v670_v1, %v682_v40  ;;  %v730_v59 = vadd.f32 %v718_v44, %v706_v42 }
 0x1e6   :  { %v614_v48 = vmul.f32 %v603_v29, %v573_v43  ;;  %v624_v7 = vadd.f32 %v612_v46, %v516_v19  ;;  %v638_v6 = vmul.f32 %v573_v43, %v1159_v38  ;;  %v685_v8 = vmul.f32 %v1091_v10, %v661_v0 }
 0x1e7   :  { %v482_v5 = vpop.permute.xlu1 %481  ;;  %v721_v13 = vmul.f32 %v1089_v9, %v661_v0  ;;  %v660_v14 = vsub.f32 %v636_v47, %v648_v37  ;;  %v683_v62 = vmul.f32 %v1078_v3, %v659_v34  ;;  %v707_v61 = vmul.f32 %v1078_v3, %v623_v58 }
 0x1e8   :  { %v626_v32 = vadd.f32 %v614_v48, %v518_v63  ;;  %v672_v23 = vmul.f32 %v624_v7, %v1094_v11  ;;  %v708_v22 = vmul.f32 %v624_v7, %v1096_v12  ;;  %v719_v4 = vmul.f32 %v1076_v2, %v659_v34 }
 0x1e9   :  { %v684_v24 = vmul.f32 %v660_v14, %v1096_v12  ;;  %v720_v51 = vmul.f32 %v660_v14, %v1094_v11  ;;  %v662_v50 = vsub.f32 %v638_v6, %v650_v45  ;;  %v746_v10 = vsel %vm23_vm0, %v694_v49, 0.0 }
 0x1ea   :  { %v770_v9 = vsel %vm23_vm0, %v730_v59, 0.0  ;;  %v674_v25 = vmul.f32 %v626_v32, %v1106_v17  ;;  %v710_v31 = vmul.f32 %v626_v32, %v1108_v18  ;;  %v697_v58 = vsub.f32 %v673_v55, %v685_v8 }
 0x1eb   :  { %v578_v3 = vpop.permute.xlu1 %577  ;;  %v733_v57 = vadd.f32 %v721_v13, %v709_v54  ;;  %v696_v39 = vsub.f32 %v672_v23, %v684_v24  ;;  %v732_v56 = vadd.f32 %v720_v51, %v708_v22  ;;  %v686_v2 = vmul.f32 %v662_v50, %v1108_v18 }
 0x1ec   :  { %v722_v12 = vmul.f32 %v662_v50, %v1106_v17  ;;  %v519_v11 = vmul.f32 %v1159_v38, %v482_v5  ;;  %v615_v26 = vmul.f32 %v603_v29, %v578_v3  ;;  %v651_v30 = vmul.f32 %v603_v29, %v482_v5 }
 0x1ed   :  { %v747_v27 = vsel %vm23_vm0, %v696_v39, 0.0  ;;  %v771_v28 = vsel %vm23_vm0, %v732_v56, 0.0  ;;  %v639_v33 = vmul.f32 %v578_v3, %v1159_v38  ;;  %v698_v53 = vsub.f32 %v674_v25, %v686_v2 }
 0x1ee   :  { %v748_v34 = vadd.f32 %v747_v27, %v746_v10  ;;  %v772_v35 = vadd.f32 %v771_v28, %v770_v9  ;;  %v734_v36 = vadd.f32 %v722_v12, %v710_v31  ;;  %v695_v60 = vsub.f32 %v1205_v20, %v683_v62 }
 0x1ef   :  { %v627_v52 = vadd.f32 %v615_v26, %v519_v11  ;;  %v663_v18 = vsub.f32 %v639_v33, %v651_v30  ;;  %v731_v21 = vadd.f32 %v719_v4, %v707_v61  ;;  %v752_v17 = vsel %vm23_vm0, %v697_v58, 0.0 }
 0x1f0   :  { %v749_v19 = vsel %vm23_vm0, %v698_v53, 0.0  ;;  %v773_v37 = vsel %vm23_vm0, %v734_v36, 0.0  ;;  %v776_v40 = vsel %vm23_vm0, %v733_v57, 0.0  ;;  %v751_v44 = vsel %vm23_vm0, %v695_v60, 0.0 }
 0x1f1   :  { %v750_v41 = vadd.f32 %v749_v19, %v748_v34  ;;  %v774_v1 = vadd.f32 %v773_v37, %v772_v35  ;;  %v675_v29 = vmul.f32 %v1101_v15, %v627_v52  ;;  %v687_v38 = vmul.f32 %v1103_v16, %v663_v18 }
 0x1f2   :  { %v711_v42 = vmul.f32 %v1103_v16, %v627_v52  ;;  %v723_v20 = vmul.f32 %v1101_v15, %v663_v18  ;;  %v775_v46 = vsel %vm23_vm0, %v731_v21, 0.0  ;;  %v753_v43 = vadd.f32 %v752_v17, %v751_v44 }
 0x1f3   :  { %v758_v0 = vmul.f32 0.33333334, %v750_v41  ;;  %v782_v63 = vmul.f32 0.33333334, %v774_v1  ;;  %v699_v45 = vsub.f32 %v675_v29, %v687_v38  ;;  %v777_v54 = vadd.f32 %v776_v40, %v775_v46 }
 0x1f4   :  { %v735_v55 = vadd.f32 %v723_v20, %v711_v42 }
 0x1f5   :  { %788 = vst.msk [vmem:[#allocation2 + $0x20] sm:$0xff] %vm23_vm0, %v758_v0  ;;  %790 = vst.msk [vmem:[#allocation2 + $0x30] sm:$0xff] %vm23_vm0, %v782_v63  ;;  %v754_v47 = vsel %vm23_vm0, %v699_v45, 0.0 }
 0x1f6   :  { %v755_v48 = vadd.f32 %v754_v47, %v753_v43  ;;  %v778_v16 = vsel %vm23_vm0, %v735_v55, 0.0 }
 0x1f7   :  { %v779_v15 = vadd.f32 %v778_v16, %v777_v54 }
 0x1f8   :  { %v759_v49 = vmul.f32 0.33333334, %v755_v48 }
 0x1f9   :  { %v783_v59 = vmul.f32 0.33333334, %v779_v15 }
 0x1fa   :  { %789 = vst.msk [vmem:[#allocation2 + $0x28] sm:$0xff] %vm23_vm0, %v759_v49 }
 0x1fb   :  { %791 = vst.msk [vmem:[#allocation2 + $0x38] sm:$0xff] %vm23_vm0, %v783_v59 }
 0x1fc   :  { %935 = shalt.err (!%p932_p4)
}
 0x1fd   :  { %s950_s11 = smov 128   ;;  %s951_s12 = smov 8  }
 0x1fe   :  { %803 = dma.vmem_to_hbm [thread:$0]  %s798_s9, 1024, %s1263_s4, [#allocation3], %s950_s11, %s950_s11, %s951_s12  }
 0x1ff   :  { %944 = dma.done.wait [#allocation3], 1024  }
 0x200   :  { %945 = vsyncadd [#allocation3], 4294966272 }
 0x201   :  { %807 = vsyncpa [#allocation3], 1 }

</bundles_post_ra>
